<compile_context>
chip_gen: v5e
topology: v5e:2x2
jax: 0.10.0
libtpu: 0.0.40
codegen_flags: <defaults>
</compile_context>

<pallas_src>
import functools

import jax
import jax.numpy as jnp
from jax.experimental import pallas as pl
from jax.experimental.pallas import tpu as pltpu


def _round_up(x, m):
    return ((x + m - 1) // m) * m


def _vq_kernel(fold, k, x_ref, w_ref, esq_ref, emb_ref, q_ref, enc_ref):
    # x_ref:   [t4, fold*D]    `fold` input rows packed per sublane row
    # w_ref:   [fold*D, fold*Kp]  block-diagonal codebook blkdiag(E^T x fold)
    # esq_ref: [1, fold*Kp]    |E|^2 tiled `fold` times; padded codes = +inf
    # emb_ref: [Kp, D]         codebook, zero-padded rows
    # q_ref:   [t4, fold*D]    quantized rows, packed like x_ref (lane-dense)
    # enc_ref: [t4, fold*K]    one-hot encodings, `fold` rows packed per row
    xf = x_ref[...]
    w = w_ref[...]
    esq = esq_ref[...]
    emb = emb_ref[...]
    kp = emb.shape[0]

    # dots[r, j*Kp + c] = <x_row(fold*r + j), E[c]> : one MXU matmul handles
    # all `fold` packed rows; no in-kernel transpose or reshape needed.
    dots = jnp.dot(xf, w, preferred_element_type=jnp.float32)   # [t4, fold*Kp]
    # |x|^2 is constant per row, so argmin(|E|^2 - 2*dots) == argmin of the
    # full squared distance.  Padded codes have esq == +inf: never selected.
    dist = esq - 2.0 * dots                                     # [t4, fold*Kp]

    q_parts = []
    e_parts = []
    for j in range(fold):
        seg = dist[:, j * kp:(j + 1) * kp]                      # 128-aligned
        idx = jnp.argmin(seg, axis=1)                           # first-min == torch
        oh = (jax.lax.broadcasted_iota(jnp.int32, seg.shape, 1)
              == idx[:, None]).astype(jnp.float32)              # [t4, Kp]
        q_parts.append(jnp.dot(oh, emb, preferred_element_type=jnp.float32))
        e_parts.append(oh[:, :k])                               # drop padded codes

    q_ref[...] = q_parts[0] if fold == 1 else jnp.concatenate(q_parts, axis=1)
    enc_ref[...] = e_parts[0] if fold == 1 else jnp.concatenate(e_parts, axis=1)


def vq_quantize_flat(flat_x, embedding, *, target_rows=4096):
    """flat_x: [N, D], embedding: [K, D].

    Returns (quantized [N, D] f32, one-hot encodings [N, K] f32).
    """
    flat_x = flat_x.astype(jnp.float32)
    n, d = flat_x.shape
    k, d2 = embedding.shape
    assert d == d2

    kp = _round_up(k, 128)                    # lane-pad the codebook axis
    fold = 128 // d if (d <= 128 and 128 % d == 0) else 1
    row_align = 8 * fold                      # packed rows must be 8-aligned

    # Row tile: big (amortizes the ~0.35us per-grid-step overhead, important
    # on v7x's 3.2 TB/s HBM), multiple of row_align, and preferably a divisor
    # of N so no pad / output-slice copies are needed.  Large N naturally
    # yields >=2 grid steps so both v7x TensorCores get work under
    # dimension_semantics=("parallel",); small N stays a single step (no
    # forced split on single-TC v5e/v6e).
    n_al = _round_up(max(n, 1), row_align)
    t = max(row_align, min((target_rows // row_align) * row_align, n_al))
    if n_al % t != 0:
        cand = t
        while cand >= max(row_align, t // 2):
            if n_al % cand == 0:
                t = cand
                break
            cand -= row_align
    n_pad = _round_up(n_al, t)

    x_p = flat_x if n_pad == n else jnp.pad(flat_x, ((0, n_pad - n), (0, 0)))
    x_f = x_p.reshape(n_pad // fold, fold * d)     # free contiguous reshape

    emb_f32 = embedding.astype(jnp.float32)
    emb_p = emb_f32 if kp == k else jnp.pad(emb_f32, ((0, kp - k), (0, 0)))
    e_sq = jnp.sum(emb_f32 ** 2, axis=1)
    if kp != k:
        e_sq = jnp.concatenate(
            [e_sq, jnp.full((kp - k,), jnp.inf, dtype=jnp.float32)])
    esq_tiled = jnp.tile(e_sq[None, :], (1, fold))               # [1, fold*Kp]
    w_blkdiag = jnp.kron(jnp.eye(fold, dtype=jnp.float32), emb_p.T)

    t4 = t // fold
    grid = (n_pad // t,)

    q_f, enc_f = pl.pallas_call(
        functools.partial(_vq_kernel, fold, k),
        out_shape=(
            jax.ShapeDtypeStruct((n_pad // fold, fold * d), jnp.float32),
            jax.ShapeDtypeStruct((n_pad // fold, fold * k), jnp.float32),
        ),
        grid_spec=pltpu.PrefetchScalarGridSpec(
            num_scalar_prefetch=0,
            grid=grid,
            in_specs=[
                pl.BlockSpec((t4, fold * d), lambda i: (i, 0)),
                pl.BlockSpec((fold * d, fold * kp), lambda i: (0, 0)),
                pl.BlockSpec((1, fold * kp), lambda i: (0, 0)),
                pl.BlockSpec((kp, d), lambda i: (0, 0)),
            ],
            out_specs=[
                pl.BlockSpec((t4, fold * d), lambda i: (i, 0)),
                pl.BlockSpec((t4, fold * k), lambda i: (i, 0)),
            ],
        ),
        compiler_params=pltpu.CompilerParams(
            dimension_semantics=("parallel",),
            # big tiles overflow the default scoped-VMEM limit on v5e (16 MiB);
            # 40 MiB is comfortably below v7x's 64 MiB physical VMEM.
            vmem_limit_bytes=40 * 1024 * 1024),
    )(x_f, w_blkdiag, esq_tiled, emb_p)

    quant = q_f.reshape(n_pad, d)       # free contiguous reshapes undo packing
    enc = enc_f.reshape(n_pad, k)
    if n_pad != n:
        quant = quant[:n]               # drop pad rows before any statistics
        enc = enc[:n]
    return quant, enc


@functools.partial(jax.jit, static_argnames=("commitment_cost", "target_rows"))
def vector_quantizer_ema_forward(x_nchw, embedding, *, commitment_cost,
                                 target_rows=4096):
    """Inference forward of VectorQuantizerEMA.

    x_nchw:    [B, C, H, W] with C == embedding_dim
    embedding: [num_embeddings, embedding_dim]
    returns (loss, quantized [B,C,H,W], perplexity, encodings [N, K])
    """
    b, c, h, w = x_nchw.shape
    k, d = embedding.shape
    assert c == d

    # NCHW -> NHWC -> [N, D] (one transpose pass; the reshape is free).
    flat_input = jnp.transpose(x_nchw, (0, 2, 3, 1)).reshape(-1, d)
    flat_input = flat_input.astype(jnp.float32)

    quant_flat, encodings = vq_quantize_flat(
        flat_input, embedding, target_rows=target_rows)

    # loss / STE / perplexity are layout-independent -> compute on flat arrays
    # (avoids an extra NHWC reshape pass of the quantized activations).
    e_latent_loss = jnp.mean(
        (jax.lax.stop_gradient(quant_flat) - flat_input) ** 2)
    loss = commitment_cost * e_latent_loss

    # straight-through estimator
    q_ste = flat_input + jax.lax.stop_gradient(quant_flat - flat_input)

    avg_probs = jnp.mean(encodings, axis=0)
    perplexity = jnp.exp(-jnp.sum(avg_probs * jnp.log(avg_probs + 1e-10)))

    quantized_nchw = jnp.transpose(q_ste.reshape(b, h, w, c), (0, 3, 1, 2))
    return loss, quantized_nchw, perplexity, encodings


if __name__ == "__main__":
    # Module hyperparameters (deterministic synthetic init).
    num_embeddings = 64
    embedding_dim = 32
    commitment_cost = 0.25

    key = jax.random.PRNGKey(0)
    k_emb, k_x = jax.random.split(key)
    embedding = jax.random.normal(
        k_emb, (num_embeddings, embedding_dim), dtype=jnp.float32)

    # Example input: NCHW, C == embedding_dim.
    B, C, H, W = 2, embedding_dim, 8, 8
    x = jax.random.normal(k_x, (B, C, H, W), dtype=jnp.float32)

    loss, quantized, perplexity, encodings = vector_quantizer_ema_forward(
        x, embedding, commitment_cost=commitment_cost)
    jax.block_until_ready((loss, quantized, perplexity, encodings))

    # Sanity checks vs a pure-JAX reference of the torch forward.
    inputs = jnp.transpose(x, (0, 2, 3, 1)).reshape(-1, embedding_dim)
    dist = (jnp.sum(inputs ** 2, 1, keepdims=True)
            + jnp.sum(embedding ** 2, 1)
            - 2.0 * inputs @ embedding.T)
    ref_idx = jnp.argmin(dist, axis=1)
    ref_quant = embedding[ref_idx]
    ref_enc = jax.nn.one_hot(ref_idx, num_embeddings, dtype=jnp.float32)
    ref_loss = commitment_cost * jnp.mean((ref_quant - inputs) ** 2)
    ref_avg = jnp.mean(ref_enc, axis=0)
    ref_ppl = jnp.exp(-jnp.sum(ref_avg * jnp.log(ref_avg + 1e-10)))

    assert quantized.shape == x.shape
    assert encodings.shape == (B * H * W, num_embeddings)
    assert bool(jnp.all(jnp.argmax(encodings, axis=1) == ref_idx))
    assert bool(jnp.all(jnp.sum(encodings, axis=1) == 1.0))
    q_flat = jnp.transpose(quantized, (0, 2, 3, 1)).reshape(-1, embedding_dim)
    assert bool(jnp.allclose(q_flat, ref_quant, atol=1e-5))
    assert bool(jnp.allclose(loss, ref_loss, atol=1e-6))
    assert bool(jnp.allclose(perplexity, ref_ppl, atol=1e-4))

    print("KERNEL_OK")
</pallas_src>

<mosaic_0001>
module attributes {stable_mosaic.version = 11 : i64} {
  func.func @_vq_kernel(%arg0: i32, %arg1: memref<32x128xf32, #tpu.memory_space<vmem>>, %arg2: memref<128x512xf32, #tpu.memory_space<vmem>>, %arg3: memref<1x512xf32, #tpu.memory_space<vmem>>, %arg4: memref<128x32xf32, #tpu.memory_space<vmem>>, %arg5: memref<32x128xf32, #tpu.memory_space<vmem>>, %arg6: memref<32x256xf32, #tpu.memory_space<vmem>>) attributes {dimension_semantics = [#tpu.dimension_semantics<parallel>], iteration_bounds = array<i64: 1>, scalar_prefetch = 0 : i64, scratch_operands = 0 : i64, tpu.core_type = #tpu.core_type<tc>, window_params = [{transform_indices = @transform_0, window_bounds = array<i64: 32, 128>}, {pipeline_mode = #tpu.pipeline_mode<synchronous>, transform_indices = @transform_1, window_bounds = array<i64: 128, 512>}, {pipeline_mode = #tpu.pipeline_mode<synchronous>, transform_indices = @transform_2, window_bounds = array<i64: 1, 512>}, {pipeline_mode = #tpu.pipeline_mode<synchronous>, transform_indices = @transform_3, window_bounds = array<i64: 128, 32>}, {transform_indices = @transform_4, window_bounds = array<i64: 32, 128>}, {transform_indices = @transform_5, window_bounds = array<i64: 32, 256>}]} {
    %c0 = arith.constant 0 : index
    %c0_0 = arith.constant 0 : index
    %0 = vector.load %arg1[%c0, %c0_0] : memref<32x128xf32, #tpu.memory_space<vmem>>, vector<32x128xf32>
    %c0_1 = arith.constant 0 : index
    %c0_2 = arith.constant 0 : index
    %1 = vector.load %arg2[%c0_1, %c0_2] : memref<128x512xf32, #tpu.memory_space<vmem>>, vector<128x512xf32>
    %c0_3 = arith.constant 0 : index
    %c0_4 = arith.constant 0 : index
    %2 = vector.load %arg3[%c0_3, %c0_4] : memref<1x512xf32, #tpu.memory_space<vmem>>, vector<1x512xf32>
    %c0_5 = arith.constant 0 : index
    %c0_6 = arith.constant 0 : index
    %3 = vector.load %arg4[%c0_5, %c0_6] : memref<128x32xf32, #tpu.memory_space<vmem>>, vector<128x32xf32>
    %cst = arith.constant dense<0.000000e+00> : vector<32x512xf32>
    %4 = tpu.matmul %0, %1, %cst {dimension_numbers = #tpu.dot_dimension_numbers<[1], [0], [0], [1], [0, 0, 1, 1], [], []>} : vector<32x128xf32>, vector<128x512xf32>, vector<32x512xf32> -> vector<32x512xf32>
    %cst_7 = arith.constant 2.000000e+00 : f32
    %5 = vector.broadcast %cst_7 : f32 to vector<32x512xf32>
    %6 = arith.mulf %5, %4 : vector<32x512xf32>
    %7 = vector.broadcast %2 : vector<1x512xf32> to vector<32x512xf32>
    %8 = arith.subf %7, %6 : vector<32x512xf32>
    %9 = vector.extract_strided_slice %8 {offsets = [0, 0], sizes = [32, 128], strides = [1, 1]} : vector<32x512xf32> to vector<32x128xf32>
    %10 = tpu.reduce_index %9 {axis = 1 : i32, kind = #tpu.reduction_kind<arg_min>} : vector<32x128xf32> -> vector<32xi32>
    %11 = tpu.iota {dimensions = array<i32: 1>} : vector<32x128xi32>
    %12 = vector.shape_cast %10 : vector<32xi32> to vector<32x1xi32>
    %13 = vector.broadcast %12 : vector<32x1xi32> to vector<32x128xi32>
    %14 = arith.cmpi eq, %11, %13 : vector<32x128xi32>
    %15 = arith.extui %14 : vector<32x128xi1> to vector<32x128xi32>
    %16 = arith.sitofp %15 : vector<32x128xi32> to vector<32x128xf32>
    %cst_8 = arith.constant dense<0.000000e+00> : vector<32x32xf32>
    %17 = tpu.matmul %16, %3, %cst_8 {dimension_numbers = #tpu.dot_dimension_numbers<[1], [0], [0], [1], [0, 0, 1, 1], [], []>} : vector<32x128xf32>, vector<128x32xf32>, vector<32x32xf32> -> vector<32x32xf32>
    %18 = vector.extract_strided_slice %16 {offsets = [0, 0], sizes = [32, 64], strides = [1, 1]} : vector<32x128xf32> to vector<32x64xf32>
    %19 = vector.extract_strided_slice %8 {offsets = [0, 128], sizes = [32, 128], strides = [1, 1]} : vector<32x512xf32> to vector<32x128xf32>
    %20 = tpu.reduce_index %19 {axis = 1 : i32, kind = #tpu.reduction_kind<arg_min>} : vector<32x128xf32> -> vector<32xi32>
    %21 = tpu.iota {dimensions = array<i32: 1>} : vector<32x128xi32>
    %22 = vector.shape_cast %20 : vector<32xi32> to vector<32x1xi32>
    %23 = vector.broadcast %22 : vector<32x1xi32> to vector<32x128xi32>
    %24 = arith.cmpi eq, %21, %23 : vector<32x128xi32>
    %25 = arith.extui %24 : vector<32x128xi1> to vector<32x128xi32>
    %26 = arith.sitofp %25 : vector<32x128xi32> to vector<32x128xf32>
    %cst_9 = arith.constant dense<0.000000e+00> : vector<32x32xf32>
    %27 = tpu.matmul %26, %3, %cst_9 {dimension_numbers = #tpu.dot_dimension_numbers<[1], [0], [0], [1], [0, 0, 1, 1], [], []>} : vector<32x128xf32>, vector<128x32xf32>, vector<32x32xf32> -> vector<32x32xf32>
    %28 = vector.extract_strided_slice %26 {offsets = [0, 0], sizes = [32, 64], strides = [1, 1]} : vector<32x128xf32> to vector<32x64xf32>
    %29 = vector.extract_strided_slice %8 {offsets = [0, 256], sizes = [32, 128], strides = [1, 1]} : vector<32x512xf32> to vector<32x128xf32>
    %30 = tpu.reduce_index %29 {axis = 1 : i32, kind = #tpu.reduction_kind<arg_min>} : vector<32x128xf32> -> vector<32xi32>
    %31 = tpu.iota {dimensions = array<i32: 1>} : vector<32x128xi32>
    %32 = vector.shape_cast %30 : vector<32xi32> to vector<32x1xi32>
    %33 = vector.broadcast %32 : vector<32x1xi32> to vector<32x128xi32>
    %34 = arith.cmpi eq, %31, %33 : vector<32x128xi32>
    %35 = arith.extui %34 : vector<32x128xi1> to vector<32x128xi32>
    %36 = arith.sitofp %35 : vector<32x128xi32> to vector<32x128xf32>
    %cst_10 = arith.constant dense<0.000000e+00> : vector<32x32xf32>
    %37 = tpu.matmul %36, %3, %cst_10 {dimension_numbers = #tpu.dot_dimension_numbers<[1], [0], [0], [1], [0, 0, 1, 1], [], []>} : vector<32x128xf32>, vector<128x32xf32>, vector<32x32xf32> -> vector<32x32xf32>
    %38 = vector.extract_strided_slice %36 {offsets = [0, 0], sizes = [32, 64], strides = [1, 1]} : vector<32x128xf32> to vector<32x64xf32>
    %39 = vector.extract_strided_slice %8 {offsets = [0, 384], sizes = [32, 128], strides = [1, 1]} : vector<32x512xf32> to vector<32x128xf32>
    %40 = tpu.reduce_index %39 {axis = 1 : i32, kind = #tpu.reduction_kind<arg_min>} : vector<32x128xf32> -> vector<32xi32>
    %41 = tpu.iota {dimensions = array<i32: 1>} : vector<32x128xi32>
    %42 = vector.shape_cast %40 : vector<32xi32> to vector<32x1xi32>
    %43 = vector.broadcast %42 : vector<32x1xi32> to vector<32x128xi32>
    %44 = arith.cmpi eq, %41, %43 : vector<32x128xi32>
    %45 = arith.extui %44 : vector<32x128xi1> to vector<32x128xi32>
    %46 = arith.sitofp %45 : vector<32x128xi32> to vector<32x128xf32>
    %cst_11 = arith.constant dense<0.000000e+00> : vector<32x32xf32>
    %47 = tpu.matmul %46, %3, %cst_11 {dimension_numbers = #tpu.dot_dimension_numbers<[1], [0], [0], [1], [0, 0, 1, 1], [], []>} : vector<32x128xf32>, vector<128x32xf32>, vector<32x32xf32> -> vector<32x32xf32>
    %48 = vector.extract_strided_slice %46 {offsets = [0, 0], sizes = [32, 64], strides = [1, 1]} : vector<32x128xf32> to vector<32x64xf32>
    %49 = tpu.concatenate %17, %27, %37, %47 in 1 : vector<32x32xf32>, vector<32x32xf32>, vector<32x32xf32>, vector<32x32xf32> -> vector<32x128xf32>
    %c0_12 = arith.constant 0 : index
    %c0_13 = arith.constant 0 : index
    %50 = vector.load %arg5[%c0_12, %c0_13] : memref<32x128xf32, #tpu.memory_space<vmem>>, vector<32x128xf32>
    tpu.vector_store %arg5[%c0_12, %c0_13], %49 {strides = array<i32>} : memref<32x128xf32, #tpu.memory_space<vmem>>, vector<32x128xf32>,
    %51 = tpu.concatenate %18, %28, %38, %48 in 1 : vector<32x64xf32>, vector<32x64xf32>, vector<32x64xf32>, vector<32x64xf32> -> vector<32x256xf32>
    %c0_14 = arith.constant 0 : index
    %c0_15 = arith.constant 0 : index
    %52 = vector.load %arg6[%c0_14, %c0_15] : memref<32x256xf32, #tpu.memory_space<vmem>>, vector<32x256xf32>
    tpu.vector_store %arg6[%c0_14, %c0_15], %51 {strides = array<i32>} : memref<32x256xf32, #tpu.memory_space<vmem>>, vector<32x256xf32>,
    return
  }
  func.func @transform_0(%arg0: i32) -> (i32, i32) {
    %c0_i32 = arith.constant 0 : i32
    %c0_i32_0 = arith.constant 0 : i32
    return %arg0, %c0_i32 : i32, i32
  }
  func.func @transform_1(%arg0: i32) -> (i32, i32) {
    %c0_i32 = arith.constant 0 : i32
    %c0_i32_0 = arith.constant 0 : i32
    %c0_i32_1 = arith.constant 0 : i32
    return %c0_i32, %c0_i32_0 : i32, i32
  }
  func.func @transform_2(%arg0: i32) -> (i32, i32) {
    %c0_i32 = arith.constant 0 : i32
    %c0_i32_0 = arith.constant 0 : i32
    %c0_i32_1 = arith.constant 0 : i32
    return %c0_i32, %c0_i32_0 : i32, i32
  }
  func.func @transform_3(%arg0: i32) -> (i32, i32) {
    %c0_i32 = arith.constant 0 : i32
    %c0_i32_0 = arith.constant 0 : i32
    %c0_i32_1 = arith.constant 0 : i32
    return %c0_i32, %c0_i32_0 : i32, i32
  }
  func.func @transform_4(%arg0: i32) -> (i32, i32) {
    %c0_i32 = arith.constant 0 : i32
    %c0_i32_0 = arith.constant 0 : i32
    return %arg0, %c0_i32 : i32, i32
  }
  func.func @transform_5(%arg0: i32) -> (i32, i32) {
    %c0_i32 = arith.constant 0 : i32
    %c0_i32_0 = arith.constant 0 : i32
    return %arg0, %c0_i32 : i32, i32
  }
}

</mosaic_0001>

<bundles_post_ra>
// kernel: vector_quantizer_ema_forward.1
= control target key start
LH: loop header
LB: loop body
LE: loop exit
PB: predicated region body
PF: predicated region fallthrough
CT: control target
= control target key end

     0   :  { %vm512_vm15 = vcmask 523264   ;;  %s642_s11 = smov 32   ;;  %s643_s12 = smov 96   ;;  %s1141_s1 = inlined_call_operand.vmem [shape: f32[128,512], index: 1, kind: input, shape index: {}]   ;;  %s1142_s0 = inlined_call_operand.vmem [shape: f32[32,128], index: 0, kind: input, shape index: {}]   ;;  %s1143_s2 = inlined_call_operand.vmem [shape: f32[1,512], index: 2, kind: input, shape index: {}]   ;;  %s1144_s3 = inlined_call_operand.vmem [shape: f32[128,32], index: 3, kind: input, shape index: {}]   ;;  %s1145_s5 = inlined_call_operand.vmem [shape: f32[32,256], index: 5, kind: output, shape index: {1}]   ;;  %s1146_s4 = inlined_call_operand.vmem [shape: f32[32,128], index: 4, kind: output, shape index: {0}]  }
   0x1   :  { %v85_v0 = vld [vmem:[%s1141_s1 + $0x1f0] sm:$0xff]  ;;  %v86_v1 = vld [vmem:[%s1141_s1 + $0x1f8] sm:$0xff]  ;;  %v84_v6 = vld [vmem:[%s1141_s1 + $0x1e8] sm:$0xff] }
   0x2   :  { %v81_v2 = vld [vmem:[%s1141_s1 + $0x1d0] sm:$0xff]  ;;  %162 = vmatpush.msra.mxu2 %v85_v0  ;;  %191 = vmatpush.msra.mxu3 %v86_v1  ;;  %v82_v3 = vld [vmem:[%s1141_s1 + $0x1d8] sm:$0xff]  ;;  %v80_v7 = vld [vmem:[%s1141_s1 + $0x1c8] sm:$0xff] }
   0x3   :  { %v77_v4 = vld [vmem:[%s1141_s1 + $0x1b0] sm:$0xff]  ;;  %v78_v5 = vld [vmem:[%s1141_s1 + $0x1b8] sm:$0xff]  ;;  %133 = vmatpush.msra.mxu1 %v84_v6  ;;  %v76_v10 = vld [vmem:[%s1141_s1 + $0x1a8] sm:$0xff] }
   0x4   :  { %163 = vmatpush.msra.mxu2 %v81_v2  ;;  %192 = vmatpush.msra.mxu3 %v82_v3  ;;  %v73_v8 = vld [vmem:[%s1141_s1 + $0x190] sm:$0xff]  ;;  %v74_v9 = vld [vmem:[%s1141_s1 + $0x198] sm:$0xff]  ;;  %v72_v13 = vld [vmem:[%s1141_s1 + $0x188] sm:$0xff] }
   0x5   :  { %134 = vmatpush.msra.mxu1 %v80_v7  ;;  %v69_v11 = vld [vmem:[%s1141_s1 + $0x170] sm:$0xff]  ;;  %v70_v12 = vld [vmem:[%s1141_s1 + $0x178] sm:$0xff]  ;;  %v68_v16 = vld [vmem:[%s1141_s1 + $0x168] sm:$0xff] }
   0x6   :  { %164 = vmatpush.msra.mxu2 %v77_v4  ;;  %193 = vmatpush.msra.mxu3 %v78_v5  ;;  %v65_v14 = vld [vmem:[%s1141_s1 + $0x150] sm:$0xff]  ;;  %v66_v15 = vld [vmem:[%s1141_s1 + $0x158] sm:$0xff]  ;;  %v64_v19 = vld [vmem:[%s1141_s1 + $0x148] sm:$0xff] }
   0x7   :  { %135 = vmatpush.msra.mxu1 %v76_v10  ;;  %v61_v17 = vld [vmem:[%s1141_s1 + $0x130] sm:$0xff]  ;;  %v62_v18 = vld [vmem:[%s1141_s1 + $0x138] sm:$0xff]  ;;  %v60_v22 = vld [vmem:[%s1141_s1 + $0x128] sm:$0xff] }
   0x8   :  { %165 = vmatpush.msra.mxu2 %v73_v8  ;;  %194 = vmatpush.msra.mxu3 %v74_v9  ;;  %v57_v20 = vld [vmem:[%s1141_s1 + $0x110] sm:$0xff]  ;;  %v58_v21 = vld [vmem:[%s1141_s1 + $0x118] sm:$0xff]  ;;  %v56_v25 = vld [vmem:[%s1141_s1 + $0x108] sm:$0xff] }
   0x9   :  { %136 = vmatpush.msra.mxu1 %v72_v13  ;;  %v53_v23 = vld [vmem:[%s1141_s1 + $0xf0] sm:$0xff]  ;;  %v54_v24 = vld [vmem:[%s1141_s1 + $0xf8] sm:$0xff]  ;;  %v52_v28 = vld [vmem:[%s1141_s1 + $0xe8] sm:$0xff] }
   0xa   :  { %166 = vmatpush.msra.mxu2 %v69_v11  ;;  %195 = vmatpush.msra.mxu3 %v70_v12  ;;  %v49_v26 = vld [vmem:[%s1141_s1 + $0xd0] sm:$0xff]  ;;  %v50_v27 = vld [vmem:[%s1141_s1 + $0xd8] sm:$0xff]  ;;  %v48_v31 = vld [vmem:[%s1141_s1 + $0xc8] sm:$0xff] }
   0xb   :  { %137 = vmatpush.msra.mxu1 %v68_v16  ;;  %v45_v29 = vld [vmem:[%s1141_s1 + $0xb0] sm:$0xff]  ;;  %v46_v30 = vld [vmem:[%s1141_s1 + $0xb8] sm:$0xff]  ;;  %v44_v34 = vld [vmem:[%s1141_s1 + $0xa8] sm:$0xff] }
   0xc   :  { %167 = vmatpush.msra.mxu2 %v65_v14  ;;  %196 = vmatpush.msra.mxu3 %v66_v15  ;;  %v41_v32 = vld [vmem:[%s1141_s1 + $0x90] sm:$0xff]  ;;  %v42_v33 = vld [vmem:[%s1141_s1 + $0x98] sm:$0xff]  ;;  %v40_v37 = vld [vmem:[%s1141_s1 + $0x88] sm:$0xff] }
   0xd   :  { %138 = vmatpush.msra.mxu1 %v64_v19  ;;  %v37_v35 = vld [vmem:[%s1141_s1 + $0x70] sm:$0xff]  ;;  %v38_v36 = vld [vmem:[%s1141_s1 + $0x78] sm:$0xff]  ;;  %v36_v40 = vld [vmem:[%s1141_s1 + $0x68] sm:$0xff] }
   0xe   :  { %168 = vmatpush.msra.mxu2 %v61_v17  ;;  %197 = vmatpush.msra.mxu3 %v62_v18  ;;  %v33_v38 = vld [vmem:[%s1141_s1 + $0x50] sm:$0xff]  ;;  %v34_v39 = vld [vmem:[%s1141_s1 + $0x58] sm:$0xff]  ;;  %v32_v43 = vld [vmem:[%s1141_s1 + $0x48] sm:$0xff] }
   0xf   :  { %139 = vmatpush.msra.mxu1 %v60_v22  ;;  %v29_v41 = vld [vmem:[%s1141_s1 + $0x30] sm:$0xff]  ;;  %v30_v42 = vld [vmem:[%s1141_s1 + $0x38] sm:$0xff]  ;;  %v83_v46 = vld [vmem:[%s1141_s1 + $0x1e0] sm:$0xff] }
  0x10   :  { %169 = vmatpush.msra.mxu2 %v57_v20  ;;  %198 = vmatpush.msra.mxu3 %v58_v21  ;;  %v25_v44 = vld [vmem:[%s1141_s1 + $0x10] sm:$0xff]  ;;  %v26_v45 = vld [vmem:[%s1141_s1 + $0x18] sm:$0xff]  ;;  %v19_v47 = vld [vmem:[%s1142_s0] sm:$0xff] }
  0x11   :  { %140 = vmatpush.msra.mxu1 %v56_v25  ;;  %v28_v48 = vld [vmem:[%s1141_s1 + $0x28] sm:$0xff]  ;;  %104 = vmatpush.msra.mxu0 %v83_v46  ;;  %v79_v49 = vld [vmem:[%s1141_s1 + $0x1c0] sm:$0xff]  ;;  %v21_v59 = vld [vmem:[%s1142_s0 + $0x10] sm:$0xff] }
  0x12   :  { %170 = vmatpush.msra.mxu2 %v53_v23  ;;  %199 = vmatpush.msra.mxu3 %v54_v24  ;;  %v24_v50 = vld [vmem:[%s1141_s1 + $0x8] sm:$0xff]  ;;  %v75_v51 = vld [vmem:[%s1141_s1 + $0x1a0] sm:$0xff]  ;;  %v22_v0 = vld [vmem:[%s1142_s0 + $0x18] sm:$0xff] }
  0x13   :  { %141 = vmatpush.msra.mxu1 %v52_v28  ;;  %105 = vmatpush.msra.mxu0 %v79_v49  ;;  %v71_v52 = vld [vmem:[%s1141_s1 + $0x180] sm:$0xff]  ;;  %v20_v54 = vld [vmem:[%s1142_s0 + $0x8] sm:$0xff]  ;;  %v103_v14 = vld [vmem:[%s1144_s3 + $0x78] sm:$0xff] }
  0x14   :  { %171 = vmatpush.msra.mxu2 %v49_v26  ;;  %200 = vmatpush.msra.mxu3 %v50_v27  ;;  %v67_v53 = vld [vmem:[%s1141_s1 + $0x160] sm:$0xff]  ;;  %v102_v15 = vld [vmem:[%s1144_s3 + $0x70] sm:$0xff]  ;;  %v101_v19 = vld [vmem:[%s1144_s3 + $0x68] sm:$0xff] }
  0x15   :  { %142 = vmatpush.msra.mxu1 %v48_v31  ;;  %106 = vmatpush.msra.mxu0 %v75_v51  ;;  %v63_v55 = vld [vmem:[%s1141_s1 + $0x140] sm:$0xff]  ;;  %v99_v28 = vld [vmem:[%s1144_s3 + $0x58] sm:$0xff] }
  0x16   :  { %172 = vmatpush.msra.mxu2 %v45_v29  ;;  %201 = vmatpush.msra.mxu3 %v46_v30  ;;  %v59_v56 = vld [vmem:[%s1141_s1 + $0x120] sm:$0xff]  ;;  %v98_v30 = vld [vmem:[%s1144_s3 + $0x50] sm:$0xff] }
  0x17   :  { %143 = vmatpush.msra.mxu1 %v44_v34  ;;  %107 = vmatpush.msra.mxu0 %v71_v52  ;;  %v55_v57 = vld [vmem:[%s1141_s1 + $0x100] sm:$0xff] }
  0x18   :  { %173 = vmatpush.msra.mxu2 %v41_v32  ;;  %202 = vmatpush.msra.mxu3 %v42_v33  ;;  %v51_v58 = vld [vmem:[%s1141_s1 + $0xe0] sm:$0xff]  ;;  %v97_v32 = vld [vmem:[%s1144_s3 + $0x48] sm:$0xff] }
  0x19   :  { %144 = vmatpush.msra.mxu1 %v40_v37  ;;  %108 = vmatpush.msra.mxu0 %v67_v53  ;;  %v47_v60 = vld [vmem:[%s1141_s1 + $0xc0] sm:$0xff] }
  0x1a   :  { %174 = vmatpush.msra.mxu2 %v37_v35  ;;  %203 = vmatpush.msra.mxu3 %v38_v36  ;;  %v43_v61 = vld [vmem:[%s1141_s1 + $0xa0] sm:$0xff] }
  0x1b   :  { %145 = vmatpush.msra.mxu1 %v36_v40  ;;  %109 = vmatpush.msra.mxu0 %v63_v55  ;;  %v39_v62 = vld [vmem:[%s1141_s1 + $0x80] sm:$0xff]  ;;  %v91_v55 = vld [vmem:[%s1144_s3 + $0x18] sm:$0xff] }
  0x1c   :  { %175 = vmatpush.msra.mxu2 %v33_v38  ;;  %204 = vmatpush.msra.mxu3 %v34_v39  ;;  %v35_v63 = vld [vmem:[%s1141_s1 + $0x60] sm:$0xff] }
  0x1d   :  { %146 = vmatpush.msra.mxu1 %v32_v43  ;;  %110 = vmatpush.msra.mxu0 %v59_v56  ;;  %v31_v1 = vld [vmem:[%s1141_s1 + $0x40] sm:$0xff]  ;;  %v94_v43 = vld [vmem:[%s1144_s3 + $0x30] sm:$0xff] }
  0x1e   :  { %176 = vmatpush.msra.mxu2 %v29_v41  ;;  %205 = vmatpush.msra.mxu3 %v30_v42  ;;  %v27_v2 = vld [vmem:[%s1141_s1 + $0x20] sm:$0xff]  ;;  %v95_v41 = vld [vmem:[%s1144_s3 + $0x38] sm:$0xff] }
  0x1f   :  { %147 = vmatpush.msra.mxu1 %v28_v48  ;;  %111 = vmatpush.msra.mxu0 %v55_v57  ;;  %v23_v3 = vld [vmem:[%s1141_s1] sm:$0xff] }
  0x20   :  { %177 = vmatpush.msra.mxu2 %v25_v44  ;;  %206 = vmatpush.msra.mxu3 %v26_v45  ;;  %v881_v4 = vld [vmem:[%s1143_s2] sm:$0xf]  ;;  %v93_v44 = vld [vmem:[%s1144_s3 + $0x28] sm:$0xff] }
  0x21   :  { %178 = vmatmul.f32.vlgmr.msra.gmra.mxu2 %v19_v47  ;;  %207 = vmatmul.f32.vlgmr.msra.gmra.mxu3 %v19_v47  ;;  %v884_v5 = vperm.slane %v881_v4, 1  ;;  %v887_v8 = vperm.slane %v881_v4, 2  ;;  %v898_v18 = vperm.slane %v881_v4, 3  ;;  %v100_v24 = vld [vmem:[%s1144_s3 + $0x60] sm:$0xff] }
  0x22   :  { %148 = vmatpush.msra.mxu1 %v24_v50  ;;  %112 = vmatpush.msra.mxu0 %v51_v58  ;;  %v96_v38 = vld [vmem:[%s1144_s3 + $0x40] sm:$0xff]  ;;  %v237_v58 = vperm.slane %v881_v4, 0 }
  0x23   :  { %149 = vmatmul.f32.vlgmr.msra.gmra.mxu1 %v19_v47  ;;  %381 = vmatpush.msrb.mxu2 %v103_v14  ;;  %v92_v51 = vld [vmem:[%s1144_s3 + $0x20] sm:$0xff] }
  0x24   :  { %113 = vmatpush.msra.mxu0 %v47_v60  ;;  %332 = vmatpush.msrb.mxu1 %v103_v14  ;;  %v89_v60 = vld [vmem:[%s1144_s3 + $0x8] sm:$0xff] }
  0x25   :  { %430 = vmatpush.msrb.mxu3 %v103_v14  ;;  %382 = vmatpush.msrb.mxu2 %v102_v15 }
  0x26   :  { %114 = vmatpush.msra.mxu0 %v43_v61  ;;  %333 = vmatpush.msrb.mxu1 %v102_v15 }
  0x27   :  { %431 = vmatpush.msrb.mxu3 %v102_v15  ;;  %383 = vmatpush.msrb.mxu2 %v101_v19 }
  0x28   :  { %115 = vmatpush.msra.mxu0 %v39_v62  ;;  %334 = vmatpush.msrb.mxu1 %v101_v19 }
  0x29   :  { %210 = vmatmul.f32.gmra.mxu3 %v20_v54  ;;  %181 = vmatmul.f32.gmra.mxu2 %v20_v54 }
  0x2a   :  { %116 = vmatpush.msra.mxu0 %v35_v63  ;;  %432 = vmatpush.msrb.mxu3 %v101_v19 }
  0x2b   :  { %152 = vmatmul.f32.gmra.mxu1 %v20_v54  ;;  %384 = vmatpush.msrb.mxu2 %v100_v24 }
  0x2c   :  { %117 = vmatpush.msra.mxu0 %v31_v1  ;;  %335 = vmatpush.msrb.mxu1 %v100_v24 }
  0x2d   :  { %385 = vmatpush.msrb.mxu2 %v99_v28  ;;  %433 = vmatpush.msrb.mxu3 %v100_v24 }
  0x2e   :  { %118 = vmatpush.msra.mxu0 %v27_v2  ;;  %336 = vmatpush.msrb.mxu1 %v99_v28 }
  0x2f   :  { %386 = vmatpush.msrb.mxu2 %v98_v30  ;;  %434 = vmatpush.msrb.mxu3 %v99_v28 }
  0x30   :  { %119 = vmatpush.msra.mxu0 %v23_v3  ;;  %337 = vmatpush.msrb.mxu1 %v98_v30 }
  0x31   :  { %213 = vmatmul.f32.gmra.mxu3 %v21_v59  ;;  %184 = vmatmul.f32.gmra.mxu2 %v21_v59 }
  0x32   :  { %120 = vmatmul.f32.vlgmr.msra.gmra.mxu0 %v19_v47  ;;  %338 = vmatpush.msrb.mxu1 %v97_v32 }
  0x33   :  { %155 = vmatmul.f32.gmra.mxu1 %v21_v59  ;;  %283 = vmatpush.msrb.mxu0 %v103_v14 }
  0x34   :  { %387 = vmatpush.msrb.mxu2 %v97_v32  ;;  %435 = vmatpush.msrb.mxu3 %v98_v30 }
  0x35   :  { %284 = vmatpush.msrb.mxu0 %v102_v15  ;;  %339 = vmatpush.msrb.mxu1 %v96_v38 }
  0x36   :  { %388 = vmatpush.msrb.mxu2 %v96_v38  ;;  %436 = vmatpush.msrb.mxu3 %v97_v32 }
  0x37   :  { %285 = vmatpush.msrb.mxu0 %v101_v19  ;;  %340 = vmatpush.msrb.mxu1 %v95_v41 }
  0x38   :  { %389 = vmatpush.msrb.mxu2 %v95_v41  ;;  %437 = vmatpush.msrb.mxu3 %v96_v38 }
  0x39   :  { %216 = vmatmul.f32.gmra.mxu3 %v22_v0  ;;  %187 = vmatmul.f32.gmra.mxu2 %v22_v0 }
  0x3a   :  { %123 = vmatmul.f32.gmra.mxu0 %v20_v54  ;;  %341 = vmatpush.msrb.mxu1 %v94_v43 }
  0x3b   :  { %158 = vmatmul.f32.gmra.mxu1 %v22_v0  ;;  %286 = vmatpush.msrb.mxu0 %v100_v24 }
  0x3c   :  { %342 = vmatpush.msrb.mxu1 %v93_v44  ;;  %390 = vmatpush.msrb.mxu2 %v94_v43 }
  0x3d   :  { %287 = vmatpush.msrb.mxu0 %v99_v28  ;;  %438 = vmatpush.msrb.mxu3 %v95_v41 }
  0x3e   :  { %343 = vmatpush.msrb.mxu1 %v92_v51  ;;  %391 = vmatpush.msrb.mxu2 %v93_v44 }
  0x3f   :  { %288 = vmatpush.msrb.mxu0 %v98_v30  ;;  %439 = vmatpush.msrb.mxu3 %v94_v43 }
  0x40   :  { %344 = vmatpush.msrb.mxu1 %v91_v55  ;;  %392 = vmatpush.msrb.mxu2 %v92_v51 }
  0x41   :  { %289 = vmatpush.msrb.mxu0 %v97_v32  ;;  %440 = vmatpush.msrb.mxu3 %v93_v44 }
  0x42   :  { %126 = vmatmul.f32.gmra.mxu0 %v21_v59  ;;  %v90_v59 = vld [vmem:[%s1144_s3 + $0x10] sm:$0xff]  ;;  %393 = vmatpush.msrb.mxu2 %v91_v55 }
  0x43   :  { %290 = vmatpush.msrb.mxu0 %v96_v38  ;;  %345 = vmatpush.msrb.mxu1 %v90_v59 }
  0x44   :  { %441 = vmatpush.msrb.mxu3 %v92_v51  ;;  %394 = vmatpush.msrb.mxu2 %v90_v59 }
  0x45   :  { %291 = vmatpush.msrb.mxu0 %v95_v41  ;;  %346 = vmatpush.msrb.mxu1 %v89_v60 }
  0x46   :  { %395 = vmatpush.msrb.mxu2 %v89_v60  ;;  %442 = vmatpush.msrb.mxu3 %v91_v55 }
  0x47   :  { %292 = vmatpush.msrb.mxu0 %v94_v43 }
  0x48   :  { %443 = vmatpush.msrb.mxu3 %v90_v59 }
  0x49   :  { %293 = vmatpush.msrb.mxu0 %v93_v44 }
  0x4a   :  { %129 = vmatmul.f32.gmra.mxu0 %v22_v0  ;;  %444 = vmatpush.msrb.mxu3 %v89_v60 }
  0x4b   :  { %294 = vmatpush.msrb.mxu0 %v92_v51 }
  0x4d   :  { %295 = vmatpush.msrb.mxu0 %v91_v55 }
  0x4f   :  { %296 = vmatpush.msrb.mxu0 %v90_v59 }
  0x51   :  { %297 = vmatpush.msrb.mxu0 %v89_v60 }
  0xa0   :  { %v150_v6 = vpop.f32.mrf.mxu1 }
  0xa1   :  { %v221_v7 = vmul.f32 2.0, %v150_v6  ;;  %v269_v6 = vlaneseq }
  0xa3   :  { %v246_v12 = vsub.f32 %v884_v5, %v221_v7  ;;  %v953_v7 = vand.u32 127, %v269_v6 }
  0xa4   :  { %v179_v9 = vpop.f32.mrf.mxu2  ;;  %v208_v10 = vpop.f32.mrf.mxu3 }
  0xa5   :  { %v222_v11 = vmul.f32 2.0, %v179_v9  ;;  %312 = vmin.index.xlane.f32.xlu1 %v246_v12  ;;  %v223_v17 = vmul.f32 2.0, %v208_v10 }
  0xa7   :  { %v247_v13 = vsub.f32 %v887_v8, %v222_v11  ;;  %v248_v26 = vsub.f32 %v898_v18, %v223_v17  ;;  %v640_v17 = vmov 0.0  }
  0xa8   :  { %v153_v16 = vpop.f32.mrf.mxu1 }
  0xa9   :  { %361 = vmin.index.xlane.f32.xlu0 %v247_v13  ;;  %v225_v29 = vmul.f32 2.0, %v153_v16  ;;  %v639_v13 = vmov 1.0  }
  0xab   :  { %v250_v36 = vsub.f32 %v884_v5, %v225_v29 }
  0xac   :  { %v211_v20 = vpop.f32.mrf.mxu3  ;;  %v182_v21 = vpop.f32.mrf.mxu2 }
  0xad   :  { %v227_v22 = vmul.f32 2.0, %v211_v20  ;;  %v226_v23 = vmul.f32 2.0, %v182_v21 }
  0xaf   :  { %v252_v25 = vsub.f32 %v898_v18, %v227_v22  ;;  %v251_v27 = vsub.f32 %v887_v8, %v226_v23  ;;  %v121_v50 = vpop.f32.mrf.mxu0 }
  0xb0   :  { %v156_v31 = vpop.f32.mrf.mxu1  ;;  %v220_v57 = vmul.f32 2.0, %v121_v50 }
  0xb1   :  { %412 = vmin.index.xlane.f32.xlu2 %v252_v25  ;;  %410 = vmin.index.xlane.f32.xlu0 %v248_v26  ;;  %v229_v42 = vmul.f32 2.0, %v156_v31 }
  0xb2   :  { %363 = vmin.index.xlane.f32.xlu1 %v251_v27  ;;  %v245_v63 = vsub.f32 %v237_v58, %v220_v57 }
  0xb3   :  { %v254_v48 = vsub.f32 %v884_v5, %v229_v42 }
  0xb4   :  { %v214_v33 = vpop.f32.mrf.mxu3  ;;  %v185_v34 = vpop.f32.mrf.mxu2 }
  0xb5   :  { %v231_v35 = vmul.f32 2.0, %v214_v33  ;;  %v230_v37 = vmul.f32 2.0, %v185_v34 }
  0xb7   :  { %v256_v39 = vsub.f32 %v898_v18, %v231_v35  ;;  %v255_v40 = vsub.f32 %v887_v8, %v230_v37  ;;  %v124_v62 = vpop.f32.mrf.mxu0 }
  0xb8   :  { %v159_v52 = vpop.f32.mrf.mxu1  ;;  %v224_v0 = vmul.f32 2.0, %v124_v62 }
  0xb9   :  { %314 = vmin.index.xlane.f32.xlu2 %v250_v36  ;;  %365 = vmin.index.xlane.f32.xlu0 %v255_v40  ;;  %v233_v56 = vmul.f32 2.0, %v159_v52 }
  0xba   :  { %414 = vmin.index.xlane.f32.xlu1 %v256_v39  ;;  %v249_v1 = vsub.f32 %v237_v58, %v224_v0 }
  0xbb   :  { %v258_v61 = vsub.f32 %v884_v5, %v233_v56  ;;  %v88_v5 = vld [vmem:[%s1144_s3] sm:$0xff]  ;;  %s641_s3 = smov 64  }
  0xbc   :  { %v217_v45 = vpop.f32.mrf.mxu3  ;;  %v188_v46 = vpop.f32.mrf.mxu2  ;;  %347 = vmatpush.msrb.mxu1 %v88_v5  ;;  %396 = vmatpush.msrb.mxu2 %v88_v5 }
  0xbd   :  { %v235_v47 = vmul.f32 2.0, %v217_v45  ;;  %v234_v49 = vmul.f32 2.0, %v188_v46  ;;  %445 = vmatpush.msrb.mxu3 %v88_v5  ;;  %298 = vmatpush.msrb.mxu0 %v88_v5 }
  0xbf   :  { %v260_v53 = vsub.f32 %v898_v18, %v235_v47  ;;  %v259_v54 = vsub.f32 %v887_v8, %v234_v49  ;;  %v127_v2 = vpop.f32.mrf.mxu0 }
  0xc0   :  { %v228_v3 = vmul.f32 2.0, %v127_v2 }
  0xc1   :  { %316 = vmin.index.xlane.f32.xlu2 %v254_v48  ;;  %367 = vmin.index.xlane.f32.xlu0 %v259_v54 }
  0xc2   :  { %416 = vmin.index.xlane.f32.xlu1 %v260_v53  ;;  %v253_v4 = vsub.f32 %v237_v58, %v228_v3 }
  0xc7   :  { %v130_v8 = vpop.f32.mrf.mxu0 }
  0xc8   :  { %v232_v9 = vmul.f32 2.0, %v130_v8 }
  0xc9   :  { %318 = vmin.index.xlane.f32.xlu2 %v258_v61  ;;  %261 = vmin.index.xlane.f32.xlu0 %v245_v63 }
  0xca   :  { %263 = vmin.index.xlane.f32.xlu1 %v249_v1  ;;  %v257_v11 = vsub.f32 %v237_v58, %v232_v9 }
  0xd1   :  { %265 = vmin.index.xlane.f32.xlu2 %v253_v4  ;;  %267 = vmin.index.xlane.f32.xlu0 %v257_v11 }
 0x118   :  { %v313_v10 = vpop.xlane.xlu1 %312 }
 0x119   :  { %vm320_vm0 = vcmp.eq.s32.totalorder %v953_v7, %v313_v10 }
 0x11a   :  { %594 = vmatmul.msk.f32.vlgmr.msrb.gmra.mxu1 %vm320_vm0, %v639_v13  ;;  %v590_v24 = vsel %vm320_vm0, 1.0, %v640_v17 }
 0x11c   :  { %v956_v12 = vpop.xlane.xlu0 %361 }
 0x11d   :  { %vm369_vm1 = vcmp.eq.s32.totalorder %v953_v7, %v956_v12 }
 0x11e   :  { %602 = vmatmul.msk.f32.vlgmr.msrb.gmra.mxu2 %vm369_vm1, %v639_v13 }
 0x124   :  { %v413_v14 = vpop.xlane.xlu2 %412  ;;  %v411_v15 = vpop.xlane.xlu0 %410 }
 0x125   :  { %vm419_vm2 = vcmp.eq.s32.totalorder %v953_v7, %v413_v14  ;;  %vm418_vm3 = vcmp.eq.s32.totalorder %v953_v7, %v411_v15  ;;  %v969_v16 = vpop.xlane.xlu1 %363 }
 0x126   :  { %v974_v18 = vsel %vm419_vm2, 1.0, %v640_v17  ;;  %v977_v19 = vsel %vm418_vm3, 1.0, %v640_v17  ;;  %610 = vmatmul.msk.f32.vlgmr.msrb.gmra.mxu3 %vm418_vm3, %v639_v13  ;;  %vm370_vm4 = vcmp.eq.s32.totalorder %v953_v7, %v969_v16  ;;  %vm517_vm3 = vcmask 785408  }
 0x127   :  { %v629_v20 = vpack.i.bf16 %v974_v18, %v977_v19  ;;  %603 = vmatmul.msk.f32.gmra.mxu2 %vm370_vm4, %v639_v13 }
 0x12c   :  { %v315_v21 = vpop.xlane.xlu2 %314  ;;  %v988_v22 = vpop.xlane.xlu0 %365 }
 0x12d   :  { %vm321_vm5 = vcmp.eq.s32.totalorder %v953_v7, %v315_v21  ;;  %v415_v23 = vpop.xlane.xlu1 %414  ;;  %vm371_vm6 = vcmp.eq.s32.totalorder %v953_v7, %v988_v22 }
 0x12e   :  { %v591_v25 = vsel %vm321_vm5, 1.0, %v640_v17  ;;  %611 = vmatmul.msk.f32.gmra.mxu3 %vm419_vm2, %v639_v13  ;;  %595 = vmatmul.msk.f32.gmra.mxu1 %vm321_vm5, %v639_v13  ;;  %vm420_vm7 = vcmp.eq.s32.totalorder %v953_v7, %v415_v23  ;;  %vm507_vm2 = vcmask 261120   ;;  %v600_v15 = vsel %vm371_vm6, 1.0, %v640_v17 }
 0x12f   :  { %v619_v26 = vpack.i.bf16 %v591_v25, %v590_v24  ;;  %604 = vmatmul.msk.f32.gmra.mxu2 %vm371_vm6, %v639_v13  ;;  %v1010_v29 = vsel %vm420_vm7, 1.0, %v640_v17 }
 0x131   :  { %620 = vrot.lane.b32.xlu2 %v619_v26, %s641_s3 }
 0x134   :  { %v317_v27 = vpop.xlane.xlu2 %316  ;;  %v1007_v28 = vpop.xlane.xlu0 %367 }
 0x135   :  { %vm322_vm8 = vcmp.eq.s32.totalorder %v953_v7, %v317_v27  ;;  %v417_v30 = vpop.xlane.xlu1 %416  ;;  %vm372_vm9 = vcmp.eq.s32.totalorder %v953_v7, %v1007_v28 }
 0x136   :  { %612 = vmatmul.msk.f32.gmra.mxu3 %vm420_vm7, %v639_v13  ;;  %vm421_vm10 = vcmp.eq.s32.totalorder %v953_v7, %v417_v30  ;;  %596 = vmatmul.msk.f32.gmra.mxu1 %vm322_vm8, %v639_v13  ;;  %v592_v35 = vsel %vm322_vm8, 1.0, %v640_v17  ;;  %v601_v18 = vsel %vm372_vm9, 1.0, %v640_v17 }
 0x137   :  { %v609_v31 = vsel %vm421_vm10, 1.0, %v640_v17  ;;  %605 = vmatmul.msk.f32.gmra.mxu2 %vm372_vm9, %v639_v13 }
 0x138   :  { %v634_v32 = vpack.i.bf16 %v609_v31, %v1010_v29 }
 0x13c   :  { %v319_v33 = vpop.xlane.xlu2 %318  ;;  %v262_v34 = vpop.xlane.xlu0 %261 }
 0x13d   :  { %vm323_vm11 = vcmp.eq.s32.totalorder %v953_v7, %v319_v33  ;;  %vm271_vm12 = vcmp.eq.s32.totalorder %v953_v7, %v262_v34  ;;  %v264_v38 = vpop.xlane.xlu1 %263 }
 0x13e   :  { %v593_v36 = vsel %vm323_vm11, 1.0, %v640_v17  ;;  %597 = vmatmul.msk.f32.gmra.mxu1 %vm323_vm11, %v639_v13  ;;  %613 = vmatmul.msk.f32.gmra.mxu3 %vm421_vm10, %v639_v13  ;;  %vm272_vm13 = vcmp.eq.s32.totalorder %v953_v7, %v264_v38  ;;  %v582_v40 = vsel %vm271_vm12, 1.0, %v640_v17 }
 0x13f   :  { %v624_v37 = vpack.i.bf16 %v593_v36, %v592_v35  ;;  %586 = vmatmul.msk.f32.vlgmr.msrb.gmra.mxu0 %vm271_vm12, %v639_v13  ;;  %v583_v41 = vsel %vm272_vm13, 1.0, %v640_v17 }
 0x144   :  { %v1033_v39 = vpop.xlane.xlu2 %265  ;;  %v1048_v47 = vpop.xlane.xlu0 %267 }
 0x145   :  { %vm273_vm14 = vcmp.eq.s32.totalorder %v953_v7, %v1033_v39  ;;  %vm274_vm0 = vcmp.eq.s32.totalorder %v953_v7, %v1048_v47  ;;  %v599_v39 = vsel %vm370_vm4, 1.0, %v640_v17 }
 0x146   :  { %v584_v38 = vsel %vm273_vm14, 1.0, %v640_v17 }
 0x147   :  { %587 = vmatmul.msk.f32.gmra.mxu0 %vm272_vm13, %v639_v13 }
 0x14f   :  { %588 = vmatmul.msk.f32.gmra.mxu0 %vm273_vm14, %v639_v13 }
 0x157   :  { %589 = vmatmul.msk.f32.gmra.mxu0 %vm274_vm0, %v639_v13 }
 0x18b   :  { %v621_v42 = vpop.permute.xlu2 %620 }
 0x18c   :  { %v623_v43 = vunpack.i.h.bf16 %v621_v42  ;;  %v622_v44 = vunpack.i.l.bf16 %v621_v42 }
 0x18e   :  { %v559_v45 = vsel %vm512_vm15, %v583_v41, %v623_v43  ;;  %v558_v46 = vsel %vm512_vm15, %v582_v40, %v622_v44  ;;  %v585_v40 = vsel %vm274_vm0, 1.0, %v640_v17 }
 0x18f   :  { %568 = vst [vmem:[%s1145_s5 + $0x10] sm:$0xff] %v559_v45 }
 0x190   :  { %566 = vst [vmem:[%s1145_s5] sm:$0xff] %v558_v46  ;;  %v598_v46 = vsel %vm369_vm1, 1.0, %v640_v17 }
 0x197   :  { %v349_v48 = vpop.f32.mrf.mxu1 }
 0x198   :  { %463 = vrot.lane.b32.xlu1 %v349_v48, %s642_s11 }
 0x1a1   :  { %v398_v49 = vpop.f32.mrf.mxu2 }
 0x1a2   :  { %479 = vrot.lane.b32.xlu1 %v398_v49, %s641_s3 }
 0x1a9   :  { %v447_v50 = vpop.f32.mrf.mxu3 }
 0x1aa   :  { %495 = vrot.lane.b32.xlu0 %v447_v50, %s643_s12  ;;  %v401_v52 = vpop.f32.mrf.mxu2 }
 0x1ab   :  { %v352_v51 = vpop.f32.mrf.mxu1 }
 0x1ac   :  { %465 = vrot.lane.b32.xlu2 %v352_v51, %s642_s11 }
 0x1b1   :  { %v450_v53 = vpop.f32.mrf.mxu3 }
 0x1b2   :  { %v404_v55 = vpop.f32.mrf.mxu2 }
 0x1b3   :  { %v355_v54 = vpop.f32.mrf.mxu1 }
 0x1b4   :  { %497 = vrot.lane.b32.xlu2 %v450_v53, %s643_s12  ;;  %467 = vrot.lane.b32.xlu0 %v355_v54, %s642_s11 }
 0x1b9   :  { %v453_v56 = vpop.f32.mrf.mxu3 }
 0x1ba   :  { %499 = vrot.lane.b32.xlu1 %v453_v56, %s643_s12  ;;  %v407_v58 = vpop.f32.mrf.mxu2 }
 0x1bb   :  { %v358_v57 = vpop.f32.mrf.mxu1 }
 0x1bc   :  { %469 = vrot.lane.b32.xlu2 %v358_v57, %s642_s11  ;;  %481 = vrot.lane.b32.xlu0 %v401_v52, %s641_s3  ;;  %v300_v63 = vpop.f32.mrf.mxu0 }
 0x1c1   :  { %v456_v59 = vpop.f32.mrf.mxu3 }
 0x1c2   :  { %485 = vrot.lane.b32.xlu1 %v407_v58, %s641_s3 }
 0x1c4   :  { %483 = vrot.lane.b32.xlu2 %v404_v55, %s641_s3  ;;  %501 = vrot.lane.b32.xlu0 %v456_v59, %s643_s12  ;;  %v303_v5 = vpop.f32.mrf.mxu0 }
 0x1ca   :  { %625 = vrot.lane.b32.xlu1 %v624_v37, %s641_s3 }
 0x1cc   :  { %635 = vrot.lane.b32.xlu2 %v634_v32, %s641_s3  ;;  %630 = vrot.lane.b32.xlu0 %v629_v20, %s641_s3  ;;  %v306_v9 = vpop.f32.mrf.mxu0 }
 0x1d4   :  { %v309_v29 = vpop.f32.mrf.mxu0 }
 0x206   :  { %v466_v60 = vpop.permute.xlu2 %465 }
 0x207   :  { %v509_v25 = vsel %vm507_vm2, %v303_v5, %v466_v60 }
 0x20a   :  { %v464_v62 = vpop.permute.xlu1 %463 }
 0x20b   :  { %v508_v1 = vsel %vm507_vm2, %v300_v63, %v464_v62 }
 0x20e   :  { %v498_v61 = vpop.permute.xlu2 %497 }
 0x214   :  { %v480_v2 = vpop.permute.xlu1 %479 }
 0x215   :  { %v513_v3 = vsel %vm512_vm15, %v508_v1, %v480_v2 }
 0x216   :  { %v470_v0 = vpop.permute.xlu2 %469 }
 0x217   :  { %v511_v30 = vsel %vm507_vm2, %v309_v29, %v470_v0 }
 0x21c   :  { %v496_v4 = vpop.permute.xlu0 %495 }
 0x21d   :  { %v518_v6 = vsel %vm517_vm3, %v513_v3, %v496_v4 }
 0x21e   :  { %522 = vst [vmem:[%s1146_s4] sm:$0xff] %v518_v6  ;;  %v484_v8 = vpop.permute.xlu2 %483 }
 0x226   :  { %v636_v10 = vpop.permute.xlu2 %635  ;;  %v468_v11 = vpop.permute.xlu0 %467 }
 0x227   :  { %v638_v13 = vunpack.i.h.bf16 %v636_v10  ;;  %v637_v14 = vunpack.i.l.bf16 %v636_v10  ;;  %v510_v21 = vsel %vm507_vm2, %v306_v9, %v468_v11 }
 0x228   :  { %v515_v23 = vsel %vm512_vm15, %v510_v21, %v484_v8 }
 0x229   :  { %v565_v19 = vsel %vm512_vm15, %v601_v18, %v638_v13  ;;  %v564_v20 = vsel %vm512_vm15, %v600_v15, %v637_v14 }
 0x22a   :  { %573 = vst [vmem:[%s1145_s5 + $0x38] sm:$0xff] %v565_v19 }
 0x22b   :  { %571 = vst [vmem:[%s1145_s5 + $0x28] sm:$0xff] %v564_v20 }
 0x22c   :  { %v500_v22 = vpop.permute.xlu1 %499 }
 0x22d   :  { %v520_v24 = vsel %vm517_vm3, %v515_v23, %v500_v22 }
 0x22e   :  { %524 = vst [vmem:[%s1146_s4 + $0x10] sm:$0xff] %v520_v24  ;;  %v482_v26 = vpop.permute.xlu0 %481 }
 0x22f   :  { %v514_v27 = vsel %vm512_vm15, %v509_v25, %v482_v26 }
 0x230   :  { %v519_v28 = vsel %vm517_vm3, %v514_v27, %v498_v61 }
 0x231   :  { %523 = vst [vmem:[%s1146_s4 + $0x8] sm:$0xff] %v519_v28 }
 0x234   :  { %v486_v31 = vpop.permute.xlu1 %485 }
 0x235   :  { %v516_v32 = vsel %vm512_vm15, %v511_v30, %v486_v31 }
 0x236   :  { %v502_v33 = vpop.permute.xlu0 %501 }
 0x237   :  { %v521_v34 = vsel %vm517_vm3, %v516_v32, %v502_v33 }
 0x238   :  { %525 = vst [vmem:[%s1146_s4 + $0x18] sm:$0xff] %v521_v34 }
 0x23c   :  { %v626_v35 = vpop.permute.xlu1 %625 }
 0x23d   :  { %v628_v36 = vunpack.i.h.bf16 %v626_v35  ;;  %v627_v37 = vunpack.i.l.bf16 %v626_v35 }
 0x23e   :  { %v631_v41 = vpop.permute.xlu0 %630 }
 0x23f   :  { %v560_v42 = vsel %vm512_vm15, %v584_v38, %v627_v37  ;;  %v561_v43 = vsel %vm512_vm15, %v585_v40, %v628_v36  ;;  %v633_v44 = vunpack.i.h.bf16 %v631_v41  ;;  %v632_v45 = vunpack.i.l.bf16 %v631_v41 }
 0x240   :  { %570 = vst [vmem:[%s1145_s5 + $0x20] sm:$0xff] %v560_v42 }
 0x241   :  { %572 = vst [vmem:[%s1145_s5 + $0x30] sm:$0xff] %v561_v43  ;;  %v563_v47 = vsel %vm512_vm15, %v599_v39, %v633_v44  ;;  %v562_v48 = vsel %vm512_vm15, %v598_v46, %v632_v45 }
 0x242   :  { %569 = vst [vmem:[%s1145_s5 + $0x18] sm:$0xff] %v563_v47 }
 0x243   :  { %567 = vst [vmem:[%s1145_s5 + $0x8] sm:$0xff] %v562_v48 }

</bundles_post_ra>
